<compile_context>
chip_gen: v7x
topology: tpu7x:2x2x1
jax: 0.10.0
libtpu: 0.0.40
codegen_flags: <defaults>
</compile_context>

<pallas_src>
import jax
import jax.numpy as jnp
from jax import lax
from jax.experimental import pallas as pl
from jax.experimental.pallas import tpu as pltpu


def gp_forward_kernel(log_amp_ref, log_len_ref, Xt_ref, alpha_ref, Zt_ref, mu_ref):
    # log_amp_ref: (1,) SMEM; log_len_ref: (D, 1); Xt_ref: (D, N); alpha_ref: (1, N)
    # Zt_ref: (D, tm); mu_ref: (1, tm)
    amp = jnp.exp(log_amp_ref[0])
    # param = sqrt(exp(log_ls))  =>  1/param = exp(-0.5 * log_ls)
    inv_param = jnp.exp(-0.5 * log_len_ref[...])                  # (D, 1)
    Xs = Xt_ref[...] * inv_param                                   # (D, N)  lane-dense
    Zs = Zt_ref[...] * inv_param                                   # (D, tm) lane-dense

    # Squared norms: 8-sublane reductions over D (XLU), no MXU pass needed.
    x2 = jnp.sum(Xs * Xs, axis=0, keepdims=True)                   # (1, N)
    z2 = jnp.sum(Zs * Zs, axis=0, keepdims=True)                   # (1, tm)

    # Fold amp * exp(-0.5*x2) into alpha: per-train-point weight row.
    w = alpha_ref[...] * (amp * jnp.exp(-0.5 * x2))                # (1, N)

    # cross[n, m] = <Xs[:, n], Zs[:, m]>  (contract D = dim 0 of both operands)
    dnums = (((0,), (0,)), ((), ()))
    cross = lax.dot_general(Xs, Zs, dnums,
                            preferred_element_type=jnp.float32)   # (N, tm)

    e = jnp.exp(cross)                                             # (N, tm)  single EUP pass
    acc = jnp.dot(w, e, preferred_element_type=jnp.float32)        # (1, tm)  lane-dense MXU row
    mu_ref[...] = acc * jnp.exp(-0.5 * z2)                         # (1, tm)  full-lane store


def gp_forward(log_amplitude, log_length_scale, X, Z, alpha, *, tm=None):
    N, D = X.shape
    M = Z.shape[0]
    if tm is None:
        # Lane-dense tiles over the query axis; single step at small M.
        if M % 256 == 0:
            tm = 256
        elif M % 128 == 0:
            tm = 128
        else:
            tm = M
    assert M % tm == 0, "M must be divisible by the query tile size"

    Xt = X.T                                   # (D, N)  N on lanes
    Zt = Z.T                                   # (D, M)  M on lanes
    alpha_row = alpha.reshape(1, N)            # (1, N)  lane-dense
    log_len_col = log_length_scale.reshape(D, 1)

    mu_row = pl.pallas_call(
        gp_forward_kernel,
        out_shape=jax.ShapeDtypeStruct((1, M), jnp.float32),
        grid=(M // tm,),
        in_specs=[
            pl.BlockSpec(memory_space=pltpu.MemorySpace.SMEM),   # log_amplitude (1,)
            pl.BlockSpec((D, 1), lambda i: (0, 0)),              # log_length (D, 1), resident
            pl.BlockSpec((D, N), lambda i: (0, 0)),              # X^T, resident
            pl.BlockSpec((1, N), lambda i: (0, 0)),              # alpha row, resident
            pl.BlockSpec((D, tm), lambda i: (0, i)),             # Z^T tile
        ],
        out_specs=pl.BlockSpec((1, tm), lambda i: (0, i)),       # mu tile (lane-dense)
        compiler_params=pltpu.CompilerParams(
            dimension_semantics=("parallel",)),
    )(log_amplitude, log_len_col, Xt, alpha_row, Zt)
    return mu_row.reshape(M, 1)


def gp_forward_ref(log_amplitude, log_length_scale, X, Z, alpha):
    # Pure-JAX reference mirroring the PyTorch forward exactly.
    param = jnp.sqrt(jnp.exp(log_length_scale))                  # (1, D)
    Xs, Zs = X / param, Z / param
    sqdist = jnp.sum((Xs[:, None, :] - Zs[None, :, :]) ** 2, axis=-1)   # (N, M)
    k = jnp.exp(log_amplitude)[0] * jnp.exp(-0.5 * sqdist)
    return k.T @ alpha


if __name__ == "__main__":
    key = jax.random.PRNGKey(0)
    N, M, D = 128, 128, 8            # train points, test points, feature dim
    kx, kz, ky = jax.random.split(key, 3)
    X = jax.random.normal(kx, (N, D), jnp.float32)
    Z = jax.random.normal(kz, (M, D), jnp.float32)
    y = jax.random.normal(ky, (N, 1), jnp.float32)

    # Deterministic "trained" parameters (stored as logs, like the nn.Parameters).
    log_length_scale = jnp.log(jnp.linspace(0.5, 2.0, D, dtype=jnp.float32))[None, :]  # (1, D)
    log_amplitude = jnp.array([jnp.log(1.5)], dtype=jnp.float32)                        # (1,)
    log_noise = jnp.log(jnp.float32(0.1))

    # "fit" state: alpha = Kxx(X)^-1 y (as computed in log_marginal_likelihood);
    # this is glue / state setup, done in plain JAX.
    param = jnp.sqrt(jnp.exp(log_length_scale))
    Xs = X / param
    sq = jnp.sum((Xs[:, None, :] - Xs[None, :, :]) ** 2, axis=-1)
    K = jnp.exp(log_amplitude)[0] * jnp.exp(-0.5 * sq) \
        + jnp.exp(log_noise) * jnp.eye(N, dtype=jnp.float32)
    L = jnp.linalg.cholesky(K)
    alpha = jax.scipy.linalg.cho_solve((L, True), y)             # (N, 1)

    mu = gp_forward(log_amplitude, log_length_scale, X, Z, alpha)
    mu = jax.block_until_ready(mu)

    mu_ref = gp_forward_ref(log_amplitude, log_length_scale, X, Z, alpha)
    assert mu.shape == (M, 1)
    assert jnp.allclose(mu, mu_ref, atol=1e-4, rtol=1e-4), \
        float(jnp.max(jnp.abs(mu - mu_ref)))
    print("KERNEL_OK")
</pallas_src>

<mosaic_0001>
module attributes {stable_mosaic.version = 11 : i64} {
  func.func @gp_forward_kernel(%arg0: i32, %arg1: memref<1xf32, #tpu.memory_space<smem>>, %arg2: memref<8x1xf32, #tpu.memory_space<vmem>>, %arg3: memref<8x128xf32, #tpu.memory_space<vmem>>, %arg4: memref<1x128xf32, #tpu.memory_space<vmem>>, %arg5: memref<8x128xf32, #tpu.memory_space<vmem>>, %arg6: memref<1x128xf32, #tpu.memory_space<vmem>>) attributes {dimension_semantics = [#tpu.dimension_semantics<parallel>], iteration_bounds = array<i64: 1>, scalar_prefetch = 0 : i64, scratch_operands = 0 : i64, tpu.core_type = #tpu.core_type<tc>, window_params = [{transform_indices = @transform_0, window_bounds = array<i64: 1>}, {pipeline_mode = #tpu.pipeline_mode<synchronous>, transform_indices = @transform_1, window_bounds = array<i64: 8, 1>}, {pipeline_mode = #tpu.pipeline_mode<synchronous>, transform_indices = @transform_2, window_bounds = array<i64: 8, 128>}, {pipeline_mode = #tpu.pipeline_mode<synchronous>, transform_indices = @transform_3, window_bounds = array<i64: 1, 128>}, {transform_indices = @transform_4, window_bounds = array<i64: 8, 128>}, {transform_indices = @transform_5, window_bounds = array<i64: 1, 128>}]} {
    %c0 = arith.constant 0 : index
    %0 = memref.load %arg1[%c0] : memref<1xf32, #tpu.memory_space<smem>>
    %1 = math.exp %0 : f32
    %c0_0 = arith.constant 0 : index
    %c0_1 = arith.constant 0 : index
    %2 = vector.load %arg2[%c0_0, %c0_1] : memref<8x1xf32, #tpu.memory_space<vmem>>, vector<8x1xf32>
    %cst = arith.constant -5.000000e-01 : f32
    %3 = vector.broadcast %cst : f32 to vector<8x1xf32>
    %4 = arith.mulf %3, %2 : vector<8x1xf32>
    %5 = math.exp %4 : vector<8x1xf32>
    %c0_2 = arith.constant 0 : index
    %c0_3 = arith.constant 0 : index
    %6 = vector.load %arg3[%c0_2, %c0_3] : memref<8x128xf32, #tpu.memory_space<vmem>>, vector<8x128xf32>
    %7 = vector.broadcast %5 : vector<8x1xf32> to vector<8x128xf32>
    %8 = arith.mulf %6, %7 : vector<8x128xf32>
    %c0_4 = arith.constant 0 : index
    %c0_5 = arith.constant 0 : index
    %9 = vector.load %arg5[%c0_4, %c0_5] : memref<8x128xf32, #tpu.memory_space<vmem>>, vector<8x128xf32>
    %10 = vector.broadcast %5 : vector<8x1xf32> to vector<8x128xf32>
    %11 = arith.mulf %9, %10 : vector<8x128xf32>
    %12 = arith.mulf %8, %8 : vector<8x128xf32>
    %cst_6 = arith.constant dense<0.000000e+00> : vector<128xf32>
    %13 = vector.multi_reduction <add>, %12, %cst_6 [0] : vector<8x128xf32> to vector<128xf32>
    %14 = vector.shape_cast %13 : vector<128xf32> to vector<1x128xf32>
    %15 = arith.mulf %11, %11 : vector<8x128xf32>
    %cst_7 = arith.constant dense<0.000000e+00> : vector<128xf32>
    %16 = vector.multi_reduction <add>, %15, %cst_7 [0] : vector<8x128xf32> to vector<128xf32>
    %17 = vector.shape_cast %16 : vector<128xf32> to vector<1x128xf32>
    %c0_8 = arith.constant 0 : index
    %c0_9 = arith.constant 0 : index
    %18 = vector.load %arg4[%c0_8, %c0_9] : memref<1x128xf32, #tpu.memory_space<vmem>>, vector<1x128xf32>
    %cst_10 = arith.constant -5.000000e-01 : f32
    %19 = vector.broadcast %cst_10 : f32 to vector<1x128xf32>
    %20 = arith.mulf %19, %14 : vector<1x128xf32>
    %21 = math.exp %20 : vector<1x128xf32>
    %22 = vector.broadcast %1 : f32 to vector<1x128xf32>
    %23 = arith.mulf %22, %21 : vector<1x128xf32>
    %24 = arith.mulf %18, %23 : vector<1x128xf32>
    %cst_11 = arith.constant dense<0.000000e+00> : vector<128x128xf32>
    %25 = tpu.matmul %8, %11, %cst_11 {dimension_numbers = #tpu.dot_dimension_numbers<[0], [0], [1], [1], [0, 1, 1, 1], [], []>} : vector<8x128xf32>, vector<8x128xf32>, vector<128x128xf32> -> vector<128x128xf32>
    %26 = math.exp %25 : vector<128x128xf32>
    %cst_12 = arith.constant dense<0.000000e+00> : vector<1x128xf32>
    %27 = tpu.matmul %24, %26, %cst_12 {dimension_numbers = #tpu.dot_dimension_numbers<[1], [0], [0], [1], [0, 0, 1, 1], [], []>} : vector<1x128xf32>, vector<128x128xf32>, vector<1x128xf32> -> vector<1x128xf32>
    %cst_13 = arith.constant -5.000000e-01 : f32
    %28 = vector.broadcast %cst_13 : f32 to vector<1x128xf32>
    %29 = arith.mulf %28, %17 : vector<1x128xf32>
    %30 = math.exp %29 : vector<1x128xf32>
    %31 = arith.mulf %27, %30 : vector<1x128xf32>
    %c0_14 = arith.constant 0 : index
    %c0_15 = arith.constant 0 : index
    %32 = vector.load %arg6[%c0_14, %c0_15] : memref<1x128xf32, #tpu.memory_space<vmem>>, vector<1x128xf32>
    tpu.vector_store %arg6[%c0_14, %c0_15], %31 {strides = array<i32>} : memref<1x128xf32, #tpu.memory_space<vmem>>, vector<1x128xf32>,
    return
  }
  func.func @transform_0(%arg0: i32) -> i32 {
    %c0_i32 = arith.constant 0 : i32
    %c0_i32_0 = arith.constant 0 : i32
    return %c0_i32 : i32
  }
  func.func @transform_1(%arg0: i32) -> (i32, i32) {
    %c0_i32 = arith.constant 0 : i32
    %c0_i32_0 = arith.constant 0 : i32
    %c0_i32_1 = arith.constant 0 : i32
    return %c0_i32, %c0_i32_0 : i32, i32
  }
  func.func @transform_2(%arg0: i32) -> (i32, i32) {
    %c0_i32 = arith.constant 0 : i32
    %c0_i32_0 = arith.constant 0 : i32
    %c0_i32_1 = arith.constant 0 : i32
    return %c0_i32, %c0_i32_0 : i32, i32
  }
  func.func @transform_3(%arg0: i32) -> (i32, i32) {
    %c0_i32 = arith.constant 0 : i32
    %c0_i32_0 = arith.constant 0 : i32
    %c0_i32_1 = arith.constant 0 : i32
    return %c0_i32, %c0_i32_0 : i32, i32
  }
  func.func @transform_4(%arg0: i32) -> (i32, i32) {
    %c0_i32 = arith.constant 0 : i32
    %c0_i32_0 = arith.constant 0 : i32
    return %c0_i32, %arg0 : i32, i32
  }
  func.func @transform_5(%arg0: i32) -> (i32, i32) {
    %c0_i32 = arith.constant 0 : i32
    %c0_i32_0 = arith.constant 0 : i32
    return %c0_i32, %arg0 : i32, i32
  }
}

</mosaic_0001>

<bundles_post_ra>
// kernel: tpu_custom_call.1
= control target key start
LH: loop header
LB: loop body
LE: loop exit
PB: predicated region body
PF: predicated region fallthrough
CT: control target
= control target key end

     0   :  { %v615_v2 = vmov 0   ;;  %s712_s0 = inlined_call_operand.<no memory space> [shape: f32[1], index: 0, kind: input, shape index: {}]   ;;  %s713_s1 = inlined_call_operand.vmem [shape: f32[8,1], index: 1, kind: input, shape index: {}]   ;;  %s714_s2 = inlined_call_operand.vmem [shape: f32[8,128], index: 2, kind: input, shape index: {}]   ;;  %s715_s3 = inlined_call_operand.vmem [shape: f32[1,128], index: 3, kind: input, shape index: {}]   ;;  %s716_s4 = inlined_call_operand.vmem [shape: f32[8,128], index: 4, kind: input, shape index: {}]   ;;  %s717_s5 = inlined_call_operand.hbm [shape: f32[1,128], index: 5, kind: output, shape index: {}]  }
   0x1   :  { %v27_v0 = vld [vmem:[%s713_s1] sm:$0xff]  ;;  %v23_v1 = vstv %s712_s0  ;;  %550 = vset.pattern.permute.xlu0 %v615_v2 }
   0x2   :  { %v28_v3 = vmul.f32 -0.5, %v27_v0  ;;  %v24_v4 = vmul.f32 1.442695, %v23_v1 }
   0x3   :  { %11 = vsyncpa [#allocation4], 0  ;;  %v31_v8 = vld [vmem:[%s714_s2] sm:$0xff]  ;;  %vm93_vm0 = vcmask 64512   ;;  %v616_v29 = vmov 0.0|0.0   ;;  %vm617_vm1 = vmmov 0  }
   0x4   :  { %v29_v5 = vmul.f32 1.442695, %v28_v3  ;;  %551 = vpow2.f32 %v24_v4  ;;  %v38_v9 = vld [vmem:[%s716_s4] sm:$0xff]  ;;  %519 = vmatprep.subr.bf16.mxu1 %v616_v29  ;;  %v618_v30 = vmov 0.0   ;;  %s619_s25 = smov [#allocation3]  }
   0x5   :  { %516 = vmatprep.mubr.msk.f32.mxu1 %vm617_vm1, %v618_v30  ;;  %s400_s26 = sshll.u32 %s619_s25, 4  ;;  %s401_s26 = int_to_ptr.vmem [resolvable:$true] %s400_s26 }
   0x6   :  { %553 = vpow2.f32 %v29_v5  ;;  %s595_s27 = scalar_lea.vmem %s401_s26, 32  ;;  %p596_p1 = scmp.lt.s32.totalorder %s401_s26, %s401_s26 }
   0xe   :  { %v552_v6 = vpop.eup %551 }
   0xf   :  { %543 = vpush %v552_v6 }
  0x10   :  { %v554_v7 = vpop.eup %553 }
  0x11   :  { %34 = vperm.xlu0 %550, %v554_v7  }
  0x40   :  { %s544_s0 = spop %543 }
  0x90   :  { %v35_v10 = vpop.permute.xlu0 %34 }
  0x91   :  { %v662_v11 = vmul.f32 %v35_v10, %v31_v8  ;;  %v664_v12 = vmul.f32 %v38_v9, %v35_v10 }
  0x93   :  { %61 = vxpose.xlu0.b32.start.end [1/1] (short) %v662_v11, 128  ;;  %458 = vmatprep.subr.mxu0 %v664_v12  ;;  %v40_v47 = vmul.f32 %v662_v11, %v662_v11 }
  0x94   :  { %459 = vmatpush3.msra.mxu0 %v664_v12 }
  0x95   :  { %v41_v51 = vrot.slane %v40_v47, 4 }
  0x97   :  { %v42_v56 = vadd.f32 %v41_v51, %v40_v47 }
  0x99   :  { %v43_v60 = vrot.slane %v42_v56, 2 }
  0x9b   :  { %v44_v1 = vadd.f32 %v43_v60, %v42_v56 }
  0x9d   :  { %v45_v5 = vrot.slane %v44_v1, 1 }
  0x9f   :  { %v46_v10 = vadd.f32 %v45_v5, %v44_v1 }
 0x113   :  { %v77_v13 = vpop.trf.xlu0 }
 0x114   :  { %460 = vmatprep.mubr.msk.f32.mxu0 %vm93_vm0, %v77_v13 }
 0x117   :  { %v78_v14 = vpop.trf.xlu0 }
 0x118   :  { %461 = vmatmul.mubr.msk.f32.vlgmr.msra.gmra.mrb[0].mxu0 %vm93_vm0, %v78_v14 }
 0x11b   :  { %v79_v15 = vpop.trf.xlu0 }
 0x11c   :  { %463 = vmatprep.mubr.msk.f32.mxu0 %vm93_vm0, %v79_v15  ;;  %v55_v15 = vmul.f32 -0.5, %v46_v10 }
 0x11f   :  { %v80_v16 = vpop.trf.xlu0 }
 0x120   :  { %464 = vmatmul.mubr.msk.f32.gmra.mrb[2].mxu0 %vm93_vm0, %v80_v16 }
 0x123   :  { %v81_v17 = vpop.trf.xlu0 }
 0x124   :  { %466 = vmatprep.mubr.msk.f32.mxu0 %vm93_vm0, %v81_v17 }
 0x127   :  { %v82_v18 = vpop.trf.xlu0 }
 0x128   :  { %467 = vmatmul.mubr.msk.f32.gmra.mrb[4].mxu0 %vm93_vm0, %v82_v18 }
 0x12b   :  { %v83_v19 = vpop.trf.xlu0 }
 0x12c   :  { %469 = vmatprep.mubr.msk.f32.mxu0 %vm93_vm0, %v83_v19 }
 0x12f   :  { %v84_v20 = vpop.trf.xlu0 }
 0x130   :  { %470 = vmatmul.mubr.msk.f32.gmra.mrb[6].mxu0 %vm93_vm0, %v84_v20  ;;  %v56_v20 = vmul.f32 1.442695, %v55_v15 }
 0x133   :  { %v85_v21 = vpop.trf.xlu0 }
 0x134   :  { %472 = vmatprep.mubr.msk.f32.mxu0 %vm93_vm0, %v85_v21 }
 0x137   :  { %v86_v22 = vpop.trf.xlu0 }
 0x138   :  { %473 = vmatmul.mubr.msk.f32.gmra.mrb[8].mxu0 %vm93_vm0, %v86_v22 }
 0x13b   :  { %v87_v23 = vpop.trf.xlu0 }
 0x13c   :  { %475 = vmatprep.mubr.msk.f32.mxu0 %vm93_vm0, %v87_v23 }
 0x13f   :  { %v88_v24 = vpop.trf.xlu0 }
 0x140   :  { %476 = vmatmul.mubr.msk.f32.gmra.mrb[10].mxu0 %vm93_vm0, %v88_v24 }
 0x143   :  { %v89_v25 = vpop.trf.xlu0 }
 0x144   :  { %478 = vmatprep.mubr.msk.f32.mxu0 %vm93_vm0, %v89_v25 }
 0x147   :  { %v90_v26 = vpop.trf.xlu0 }
 0x148   :  { %479 = vmatmul.mubr.msk.f32.gmra.mrb[12].mxu0 %vm93_vm0, %v90_v26 }
 0x14b   :  { %v91_v27 = vpop.trf.xlu0 }
 0x14c   :  { %481 = vmatprep.mubr.msk.f32.mxu0 %vm93_vm0, %v91_v27 }
 0x14f   :  { %v92_v28 = vpop.trf.xlu0 }
 0x150   :  { %482 = vmatmul.mubr.msk.f32.gmra.mrb[14].mxu0 %vm93_vm0, %v92_v28 }
 0x1eb   :  { %v462_v31 = vpop.f32.mrb[0].mxu0 }
 0x1ec   :  { %v289_v32 = vmul.f32 1.442695, %v462_v31  ;;  %v208_v33 = vpop.f32.mrb[1].mxu0 }
 0x1ed   :  { %v287_v34 = vmul.f32 1.442695, %v208_v33 }
 0x1ee   :  { %555 = vpow2.f32 %v289_v32  ;;  %v58_v32 = vstv %s544_s0 }
 0x1ef   :  { %557 = vpow2.f32 %v287_v34 }
 0x1f3   :  { %v465_v35 = vpop.f32.mrb[2].mxu0 }
 0x1f4   :  { %v293_v36 = vmul.f32 1.442695, %v465_v35  ;;  %v218_v37 = vpop.f32.mrb[3].mxu0 }
 0x1f5   :  { %v291_v38 = vmul.f32 1.442695, %v218_v37 }
 0x1f6   :  { %559 = vpow2.f32 %v293_v36  ;;  %v54_v36 = vld [vmem:[%s715_s3] sm:$0x1]  ;;  %s591_s3 = scalar_lea.vmem %s401_s26, 16 }
 0x1f7   :  { %561 = vpow2.f32 %v291_v38  ;;  %p592_p0 = scmp.ne.s32.totalorder %s401_s26, %s591_s3  ;;  %p597_p2 = scmp.lt.s32.totalorder %s595_s27, %s591_s3 }
 0x1f8   :  { %v556_v39 = vpop.eup %555 }
 0x1f9   :  { %v558_v40 = vpop.eup %557  ;;  %p598_p3 = por %p597_p2, %p596_p1 }
 0x1fa   :  { %v520_v41 = vpack.c.bf16 %v556_v39, %v558_v40  ;;  %v47_v39 = vmul.f32 %v664_v12, %v664_v12 }
 0x1fb   :  { %v468_v42 = vpop.f32.mrb[4].mxu0  ;;  %p599_p4 = pnand %p598_p3, %p592_p0 }
 0x1fc   :  { %v297_v43 = vmul.f32 1.442695, %v468_v42  ;;  %v228_v44 = vpop.f32.mrb[5].mxu0  ;;  %521 = vmatpush3.bf16.msra.mxu1 %v520_v41  ;;  %v48_v40 = vrot.slane %v47_v39, 4 }
 0x1fd   :  { %v295_v45 = vmul.f32 1.442695, %v228_v44  ;;  %522 = vmatprep.subr.bf16.mxu1 %v616_v29 }
 0x1fe   :  { %563 = vpow2.f32 %v297_v43  ;;  %v49_v41 = vadd.f32 %v48_v40, %v47_v39 }
 0x1ff   :  { %565 = vpow2.f32 %v295_v45 }
 0x200   :  { %v560_v46 = vpop.eup %559  ;;  %v50_v42 = vrot.slane %v49_v41, 2 }
 0x201   :  { %v562_v48 = vpop.eup %561 }
 0x202   :  { %v523_v49 = vpack.c.bf16 %v560_v46, %v562_v48 }
 0x203   :  { %v471_v50 = vpop.f32.mrb[6].mxu0 }
 0x204   :  { %v301_v52 = vmul.f32 1.442695, %v471_v50  ;;  %v238_v53 = vpop.f32.mrb[7].mxu0  ;;  %524 = vmatpush3.bf16.msra.mxu1 %v523_v49 }
 0x205   :  { %v299_v54 = vmul.f32 1.442695, %v238_v53  ;;  %525 = vmatprep.subr.bf16.mxu1 %v616_v29 }
 0x206   :  { %567 = vpow2.f32 %v301_v52 }
 0x207   :  { %569 = vpow2.f32 %v299_v54 }
 0x208   :  { %v564_v55 = vpop.eup %563 }
 0x209   :  { %v566_v57 = vpop.eup %565 }
 0x20a   :  { %v526_v58 = vpack.c.bf16 %v564_v55, %v566_v57 }
 0x20b   :  { %v474_v59 = vpop.f32.mrb[8].mxu0 }
 0x20c   :  { %v305_v61 = vmul.f32 1.442695, %v474_v59  ;;  %v248_v62 = vpop.f32.mrb[9].mxu0  ;;  %527 = vmatpush3.bf16.msra.mxu1 %v526_v58 }
 0x20d   :  { %v303_v63 = vmul.f32 1.442695, %v248_v62  ;;  %528 = vmatprep.subr.bf16.mxu1 %v616_v29 }
 0x20e   :  { %571 = vpow2.f32 %v305_v61 }
 0x20f   :  { %573 = vpow2.f32 %v303_v63 }
 0x210   :  { %v568_v0 = vpop.eup %567 }
 0x211   :  { %v570_v2 = vpop.eup %569 }
 0x212   :  { %v529_v3 = vpack.c.bf16 %v568_v0, %v570_v2 }
 0x213   :  { %v477_v4 = vpop.f32.mrb[10].mxu0 }
 0x214   :  { %v309_v6 = vmul.f32 1.442695, %v477_v4  ;;  %v258_v7 = vpop.f32.mrb[11].mxu0  ;;  %530 = vmatpush3.bf16.msra.mxu1 %v529_v3 }
 0x215   :  { %v307_v8 = vmul.f32 1.442695, %v258_v7  ;;  %531 = vmatprep.subr.bf16.mxu1 %v616_v29 }
 0x216   :  { %575 = vpow2.f32 %v309_v6 }
 0x217   :  { %577 = vpow2.f32 %v307_v8 }
 0x218   :  { %v572_v9 = vpop.eup %571 }
 0x219   :  { %v574_v11 = vpop.eup %573 }
 0x21a   :  { %v532_v13 = vpack.c.bf16 %v572_v9, %v574_v11 }
 0x21b   :  { %v480_v14 = vpop.f32.mrb[12].mxu0 }
 0x21c   :  { %v313_v16 = vmul.f32 1.442695, %v480_v14  ;;  %v268_v17 = vpop.f32.mrb[13].mxu0  ;;  %533 = vmatpush3.bf16.msra.mxu1 %v532_v13 }
 0x21d   :  { %v311_v18 = vmul.f32 1.442695, %v268_v17  ;;  %534 = vmatprep.subr.bf16.mxu1 %v616_v29 }
 0x21e   :  { %579 = vpow2.f32 %v313_v16 }
 0x21f   :  { %581 = vpow2.f32 %v311_v18 }
 0x220   :  { %v576_v19 = vpop.eup %575  ;;  %583 = vpow2.f32 %v56_v20 }
 0x221   :  { %v578_v21 = vpop.eup %577 }
 0x222   :  { %v535_v22 = vpack.c.bf16 %v576_v19, %v578_v21 }
 0x223   :  { %v483_v23 = vpop.f32.mrb[14].mxu0 }
 0x224   :  { %v317_v24 = vmul.f32 1.442695, %v483_v23  ;;  %v278_v25 = vpop.f32.mrb[15].mxu0  ;;  %536 = vmatpush3.bf16.msra.mxu1 %v535_v22 }
 0x225   :  { %v315_v26 = vmul.f32 1.442695, %v278_v25  ;;  %537 = vmatprep.subr.bf16.mxu1 %v616_v29 }
 0x226   :  { %585 = vpow2.f32 %v317_v24 }
 0x227   :  { %587 = vpow2.f32 %v315_v26 }
 0x228   :  { %v580_v27 = vpop.eup %579 }
 0x229   :  { %v582_v28 = vpop.eup %581 }
 0x22a   :  { %v538_v30 = vpack.c.bf16 %v580_v27, %v582_v28  ;;  %v584_v31 = vpop.eup %583 }
 0x22b   :  { %v59_v35 = vmul.f32 %v584_v31, %v58_v32 }
 0x22c   :  { %539 = vmatpush3.bf16.msra.mxu1 %v538_v30 }
 0x22d   :  { %540 = vmatprep.subr.bf16.mxu1 %v616_v29  ;;  %v60_v38 = vmul.f32 %v59_v35, %v54_v36  ;;  %v51_v29 = vadd.f32 %v50_v42, %v49_v41 }
 0x22f   :  { %v52_v43 = vrot.slane %v51_v29, 1 }
 0x230   :  { %v586_v33 = vpop.eup %585 }
 0x231   :  { %v588_v34 = vpop.eup %587  ;;  %v53_v44 = vadd.f32 %v52_v43, %v51_v29 }
 0x232   :  { %v541_v37 = vpack.c.bf16 %v586_v33, %v588_v34 }
 0x233   :  { %v389_v45 = vmul.f32 -0.5, %v53_v44 }
 0x234   :  { %542 = vmatpush3.bf16.msra.mxu1 %v541_v37 }
 0x235   :  { %v390_v46 = vmul.f32 1.442695, %v389_v45 }
 0x237   :  { %517 = vmatmul.mubr.f32.vlgmr.msra.gmra.mrb[0].mxu1 %v60_v38  ;;  %589 = vpow2.f32 %v390_v46 }
 0x241   :  { %v590_v47 = vpop.eup %589 }
 0x30a   :  { %v385_v48 = vpop.f32.mrb[0].mxu1 }
 0x30b   :  { %v392_v49 = vmul.f32 %v590_v47, %v385_v48  ;;  %v518_v50 = vpop.f32.mrb[1].mxu1 }
 0x30d   :  { %393 = vst [vmem:[#allocation3] sm:$0x1] %v392_v49 }
 0x30e   :  { %602 = shalt.err (!%p599_p4)
}
 0x30f   :  { %s603_s30 = scalar_lea.hbm %s717_s5, 16 }
 0x310   :  { %p604_p5 = scmp.ne.s32.totalorder %s717_s5, %s603_s30  ;;  %p607_p6 = scmp.lt.u32.totalorder %s603_s30, %s717_s5 }
 0x312   :  { %p609_p7 = pnand %p607_p6, %p604_p5 }
 0x314   :  { %612 = shalt.err (!%p609_p7)
}
 0x315   :  { %403 = dma.vmem_to_hbm [thread:$0]  %s401_s26, 16, %s717_s5, [#allocation4]  }
 0x316   :  { %613 = dma.done.wait [#allocation4], 16  }
 0x317   :  { %614 = vsyncadd [#allocation4], 4294967280 }
 0x318   :  { %407 = vsyncpa [#allocation4], 1 }

</bundles_post_ra>
